<compile_context>
chip_gen: v5e
topology: v5e:2x2
jax: 0.10.0
libtpu: 0.0.40
codegen_flags: <defaults>
</compile_context>

<pallas_src>
import jax
import jax.numpy as jnp
from jax.experimental import pallas as pl
from jax.experimental.pallas import tpu as pltpu

D_IN, D_HID, D_OUT = 512, 256, 128
TILE_B = 512  # default batch tile (rows); shrunk automatically for small batches


def _round_up(n, m):
    return ((n + m - 1) // m) * m


def mlp_logsoftmax_kernel(x_ref, w1_ref, b1_ref, alpha_ref, w2_ref, b2_ref, o_ref):
    # x_ref: (TB, 512) bf16 | w1: (512, 256) bf16 | b1: (1, 256) f32 | alpha: (1, 1) f32 SMEM
    # w2: (256, 128) bf16  | b2: (1, 128) f32    | o_ref: (TB, 128) f32
    x = x_ref[...]

    # Linear(512 -> 256): bf16 MXU matmul, f32 accumulation, f32 bias.
    h = jnp.dot(x, w1_ref[...], preferred_element_type=jnp.float32) + b1_ref[...]

    # PReLU with a single shared parameter (PyTorch default num_parameters=1).
    alpha = alpha_ref[0, 0]
    h = jnp.where(h >= 0.0, h, alpha * h)

    # Linear(256 -> 128): cast activation to bf16 for the MXU, accumulate in f32.
    z = jnp.dot(h.astype(w2_ref.dtype), w2_ref[...],
                preferred_element_type=jnp.float32) + b2_ref[...]

    # LogSoftmax(dim=1): numerically-stable log-softmax along the feature axis
    # (max/sum reductions on XLU, exp/log on EUP -> free filler next to the MXU work).
    m = jnp.max(z, axis=-1, keepdims=True)
    s = z - m
    lse = jnp.log(jnp.sum(jnp.exp(s), axis=-1, keepdims=True))
    o_ref[...] = (s - lse).astype(o_ref.dtype)


def my_module2_forward(x, w1, b1, alpha, w2, b2, *, tile_b=TILE_B):
    B = x.shape[0]
    # Batch tile: multiple of 8 (sublane), never larger than the (padded) batch.
    tb = min(tile_b, _round_up(B, 8))
    Bp = _round_up(B, tb)

    # bf16 operands for the MXU; biases / epilogue stay f32.
    xb = x.astype(jnp.bfloat16)
    if Bp != B:
        xb = jnp.pad(xb, ((0, Bp - B), (0, 0)))  # padded rows are sliced off below
    w1b = w1.astype(jnp.bfloat16)
    w2b = w2.astype(jnp.bfloat16)

    out = pl.pallas_call(
        mlp_logsoftmax_kernel,
        out_shape=jax.ShapeDtypeStruct((Bp, D_OUT), jnp.float32),
        grid=(Bp // tb,),
        in_specs=[
            pl.BlockSpec((tb, D_IN), lambda i: (i, 0)),                        # x tile (pipelined)
            pl.BlockSpec((D_IN, D_HID), lambda i: (0, 0)),                     # w1 resident in VMEM
            pl.BlockSpec((1, D_HID), lambda i: (0, 0)),                        # b1 resident
            pl.BlockSpec((1, 1), lambda i: (0, 0), memory_space=pltpu.SMEM),   # alpha scalar
            pl.BlockSpec((D_HID, D_OUT), lambda i: (0, 0)),                    # w2 resident
            pl.BlockSpec((1, D_OUT), lambda i: (0, 0)),                        # b2 resident
        ],
        out_specs=pl.BlockSpec((tb, D_OUT), lambda i: (i, 0)),
        compiler_params=pltpu.CompilerParams(
            dimension_semantics=("parallel",),  # shard batch tiles across TCs (v7x megacore)
        ),
    )(xb, w1b, b1, alpha, w2b, b2)
    return out[:B]
    # TODO(synk): for tiny production batches (B~1-8) the win is keeping the ~320 KiB bf16
    # weights resident across calls (cross-pallas_call prefetch / fusion), not in-kernel tuning.


def init_params(key):
    k1, k2, k3, k4 = jax.random.split(key, 4)
    # PyTorch-Linear-style uniform init: U(-1/sqrt(fan_in), 1/sqrt(fan_in))
    lim1 = 1.0 / jnp.sqrt(jnp.float32(D_IN))
    lim2 = 1.0 / jnp.sqrt(jnp.float32(D_HID))
    w1 = jax.random.uniform(k1, (D_IN, D_HID), jnp.float32, -lim1, lim1)
    b1 = jax.random.uniform(k2, (1, D_HID), jnp.float32, -lim1, lim1)
    w2 = jax.random.uniform(k3, (D_HID, D_OUT), jnp.float32, -lim2, lim2)
    b2 = jax.random.uniform(k4, (1, D_OUT), jnp.float32, -lim2, lim2)
    alpha = jnp.full((1, 1), 0.25, jnp.float32)  # PReLU default init
    return w1, b1, alpha, w2, b2


def reference_forward(x, w1, b1, alpha, w2, b2):
    h = x @ w1 + b1
    h = jnp.where(h >= 0.0, h, alpha[0, 0] * h)
    z = h @ w2 + b2
    return jax.nn.log_softmax(z, axis=1)


if __name__ == "__main__":
    key = jax.random.PRNGKey(0)
    kx, kp = jax.random.split(key)
    w1, b1, alpha, w2, b2 = init_params(kp)

    # Small-batch check (module's example is [1, 512]; batch is row-wise independent).
    B = 8
    x = jax.random.normal(kx, (B, D_IN), jnp.float32)
    out = jax.block_until_ready(my_module2_forward(x, w1, b1, alpha, w2, b2))
    ref = reference_forward(x, w1, b1, alpha, w2, b2)
    assert out.shape == (B, D_OUT)
    # bf16 matmul operands (f32 accumulation) -> allow ~1e-2-level drift vs the f32 reference.
    assert jnp.allclose(out, ref, atol=3e-2, rtol=3e-2)

    # Multi-tile / ragged-batch check to exercise the grid + padding path.
    B2 = 200
    x2 = jax.random.normal(jax.random.fold_in(kx, 1), (B2, D_IN), jnp.float32)
    out2 = jax.block_until_ready(my_module2_forward(x2, w1, b1, alpha, w2, b2, tile_b=64))
    ref2 = reference_forward(x2, w1, b1, alpha, w2, b2)
    assert out2.shape == (B2, D_OUT)
    assert jnp.allclose(out2, ref2, atol=3e-2, rtol=3e-2)

    print("KERNEL_OK")
</pallas_src>

<mosaic_0001>
module attributes {stable_mosaic.version = 11 : i64} {
  func.func @mlp_logsoftmax_kernel(%arg0: i32, %arg1: memref<8x512xbf16, #tpu.memory_space<vmem>>, %arg2: memref<512x256xbf16, #tpu.memory_space<vmem>>, %arg3: memref<1x256xf32, #tpu.memory_space<vmem>>, %arg4: memref<1x1xf32, #tpu.memory_space<smem>>, %arg5: memref<256x128xbf16, #tpu.memory_space<vmem>>, %arg6: memref<1x128xf32, #tpu.memory_space<vmem>>, %arg7: memref<8x128xf32, #tpu.memory_space<vmem>>) attributes {dimension_semantics = [#tpu.dimension_semantics<parallel>], iteration_bounds = array<i64: 1>, scalar_prefetch = 0 : i64, scratch_operands = 0 : i64, tpu.core_type = #tpu.core_type<tc>, window_params = [{transform_indices = @transform_0, window_bounds = array<i64: 8, 512>}, {pipeline_mode = #tpu.pipeline_mode<synchronous>, transform_indices = @transform_1, window_bounds = array<i64: 512, 256>}, {pipeline_mode = #tpu.pipeline_mode<synchronous>, transform_indices = @transform_2, window_bounds = array<i64: 1, 256>}, {transform_indices = @transform_3, window_bounds = array<i64: 1, 1>}, {pipeline_mode = #tpu.pipeline_mode<synchronous>, transform_indices = @transform_4, window_bounds = array<i64: 256, 128>}, {pipeline_mode = #tpu.pipeline_mode<synchronous>, transform_indices = @transform_5, window_bounds = array<i64: 1, 128>}, {transform_indices = @transform_6, window_bounds = array<i64: 8, 128>}]} {
    %c0 = arith.constant 0 : index
    %c0_0 = arith.constant 0 : index
    %0 = vector.load %arg1[%c0, %c0_0] : memref<8x512xbf16, #tpu.memory_space<vmem>>, vector<8x512xbf16>
    %c0_1 = arith.constant 0 : index
    %c0_2 = arith.constant 0 : index
    %1 = vector.load %arg2[%c0_1, %c0_2] : memref<512x256xbf16, #tpu.memory_space<vmem>>, vector<512x256xbf16>
    %cst = arith.constant dense<0.000000e+00> : vector<8x256xf32>
    %2 = tpu.matmul %0, %1, %cst {dimension_numbers = #tpu.dot_dimension_numbers<[1], [0], [0], [1], [0, 0, 1, 1], [], []>} : vector<8x512xbf16>, vector<512x256xbf16>, vector<8x256xf32> -> vector<8x256xf32>
    %c0_3 = arith.constant 0 : index
    %c0_4 = arith.constant 0 : index
    %3 = vector.load %arg3[%c0_3, %c0_4] : memref<1x256xf32, #tpu.memory_space<vmem>>, vector<1x256xf32>
    %4 = vector.broadcast %3 : vector<1x256xf32> to vector<8x256xf32>
    %5 = arith.addf %2, %4 : vector<8x256xf32>
    %c0_5 = arith.constant 0 : index
    %c0_6 = arith.constant 0 : index
    %6 = memref.load %arg4[%c0_5, %c0_6] : memref<1x1xf32, #tpu.memory_space<smem>>
    %cst_7 = arith.constant 0.000000e+00 : f32
    %7 = vector.broadcast %cst_7 : f32 to vector<8x256xf32>
    %8 = arith.cmpf oge, %5, %7 : vector<8x256xf32>
    %9 = vector.broadcast %6 : f32 to vector<8x256xf32>
    %10 = arith.mulf %9, %5 : vector<8x256xf32>
    %11 = arith.select %8, %5, %10 : vector<8x256xi1>, vector<8x256xf32>
    %12 = arith.truncf %11 : vector<8x256xf32> to vector<8x256xbf16>
    %c0_8 = arith.constant 0 : index
    %c0_9 = arith.constant 0 : index
    %13 = vector.load %arg5[%c0_8, %c0_9] : memref<256x128xbf16, #tpu.memory_space<vmem>>, vector<256x128xbf16>
    %cst_10 = arith.constant dense<0.000000e+00> : vector<8x128xf32>
    %14 = tpu.matmul %12, %13, %cst_10 {dimension_numbers = #tpu.dot_dimension_numbers<[1], [0], [0], [1], [0, 0, 1, 1], [], []>} : vector<8x256xbf16>, vector<256x128xbf16>, vector<8x128xf32> -> vector<8x128xf32>
    %c0_11 = arith.constant 0 : index
    %c0_12 = arith.constant 0 : index
    %15 = vector.load %arg6[%c0_11, %c0_12] : memref<1x128xf32, #tpu.memory_space<vmem>>, vector<1x128xf32>
    %16 = vector.broadcast %15 : vector<1x128xf32> to vector<8x128xf32>
    %17 = arith.addf %14, %16 : vector<8x128xf32>
    %cst_13 = arith.constant dense<0xFF800000> : vector<8xf32>
    %18 = vector.multi_reduction <maximumf>, %17, %cst_13 [1] : vector<8x128xf32> to vector<8xf32>
    %19 = vector.shape_cast %18 : vector<8xf32> to vector<8x1xf32>
    %20 = vector.broadcast %19 : vector<8x1xf32> to vector<8x128xf32>
    %21 = arith.subf %17, %20 : vector<8x128xf32>
    %22 = math.exp %21 : vector<8x128xf32>
    %cst_14 = arith.constant dense<0.000000e+00> : vector<8xf32>
    %23 = vector.multi_reduction <add>, %22, %cst_14 [1] : vector<8x128xf32> to vector<8xf32>
    %24 = vector.shape_cast %23 : vector<8xf32> to vector<8x1xf32>
    %25 = math.log %24 : vector<8x1xf32>
    %26 = vector.broadcast %25 : vector<8x1xf32> to vector<8x128xf32>
    %27 = arith.subf %21, %26 : vector<8x128xf32>
    %c0_15 = arith.constant 0 : index
    %c0_16 = arith.constant 0 : index
    %28 = vector.load %arg7[%c0_15, %c0_16] : memref<8x128xf32, #tpu.memory_space<vmem>>, vector<8x128xf32>
    tpu.vector_store %arg7[%c0_15, %c0_16], %27 {strides = array<i32>} : memref<8x128xf32, #tpu.memory_space<vmem>>, vector<8x128xf32>,
    return
  }
  func.func @transform_0(%arg0: i32) -> (i32, i32) {
    %c0_i32 = arith.constant 0 : i32
    %c0_i32_0 = arith.constant 0 : i32
    return %arg0, %c0_i32 : i32, i32
  }
  func.func @transform_1(%arg0: i32) -> (i32, i32) {
    %c0_i32 = arith.constant 0 : i32
    %c0_i32_0 = arith.constant 0 : i32
    %c0_i32_1 = arith.constant 0 : i32
    return %c0_i32, %c0_i32_0 : i32, i32
  }
  func.func @transform_2(%arg0: i32) -> (i32, i32) {
    %c0_i32 = arith.constant 0 : i32
    %c0_i32_0 = arith.constant 0 : i32
    %c0_i32_1 = arith.constant 0 : i32
    return %c0_i32, %c0_i32_0 : i32, i32
  }
  func.func @transform_3(%arg0: i32) -> (i32, i32) {
    %c0_i32 = arith.constant 0 : i32
    %c0_i32_0 = arith.constant 0 : i32
    %c0_i32_1 = arith.constant 0 : i32
    return %c0_i32, %c0_i32_0 : i32, i32
  }
  func.func @transform_4(%arg0: i32) -> (i32, i32) {
    %c0_i32 = arith.constant 0 : i32
    %c0_i32_0 = arith.constant 0 : i32
    %c0_i32_1 = arith.constant 0 : i32
    return %c0_i32, %c0_i32_0 : i32, i32
  }
  func.func @transform_5(%arg0: i32) -> (i32, i32) {
    %c0_i32 = arith.constant 0 : i32
    %c0_i32_0 = arith.constant 0 : i32
    %c0_i32_1 = arith.constant 0 : i32
    return %c0_i32, %c0_i32_0 : i32, i32
  }
  func.func @transform_6(%arg0: i32) -> (i32, i32) {
    %c0_i32 = arith.constant 0 : i32
    %c0_i32_0 = arith.constant 0 : i32
    return %arg0, %c0_i32 : i32, i32
  }
}

</mosaic_0001>

<bundles_post_ra>
// kernel: tpu_custom_call.1
= control target key start
LH: loop header
LB: loop body
LE: loop exit
PB: predicated region body
PF: predicated region fallthrough
CT: control target
= control target key end

     0   :  { %12 = vsyncpa [#allocation4], 0  ;;  %s1372_s0 = inlined_call_operand.hbm [shape: bf16[8,512], index: 0, kind: input, shape index: {}]   ;;  %s1373_s1 = inlined_call_operand.hbm [shape: bf16[512,256], index: 1, kind: input, shape index: {}]   ;;  %s1374_s2 = inlined_call_operand.vmem [shape: f32[1,256], index: 2, kind: input, shape index: {}]   ;;  %s1375_s3 = inlined_call_operand.<no memory space> [shape: f32[1,1], index: 3, kind: input, shape index: {}]   ;;  %s1376_s4 = inlined_call_operand.hbm [shape: bf16[256,128], index: 4, kind: input, shape index: {}]   ;;  %s1377_s5 = inlined_call_operand.vmem [shape: f32[1,128], index: 5, kind: input, shape index: {}]   ;;  %s1378_s6 = inlined_call_operand.hbm [shape: f32[8,128], index: 6, kind: output, shape index: {}]  }
   0x1   :  { %13 = vsyncpa [#allocation7], 0  ;;  %s30_s23 = sshll.u32 %s1373_s1, 4  ;;  %s31_s23 = int_to_ptr.hbm [resolvable:$true] %s30_s23 }
   0x2   :  { %14 = vsyncpa [#allocation5], 0  ;;  %s1292_s24 = smov [#allocation6]   ;;  %s20_s28 = sshll.u32 %s1372_s0, 4  ;;  %s21_s28 = int_to_ptr.hbm [resolvable:$true] %s20_s28 }
   0x3   :  { %s32_s25 = sshll.u32 %s1292_s24, 4  ;;  %s1293_s29 = smov 128   ;;  %s33_s25 = int_to_ptr.vmem [resolvable:$true] %s32_s25 }
   0x4   :  { %s1294_s30 = smov 8   ;;  %s1295_s7 = smov [#allocation3]  }
   0x5   :  { %38 = dma.hbm_to_vmem [thread:$0]  %s31_s23, 8192, %s33_s25, [#allocation7], %s1293_s29, %s1293_s29, %s1294_s30  }
   0x6   :  { %s22_s8 = sshll.u32 %s1295_s7, 4  ;;  %s47_s11 = sshll.u32 %s1376_s4, 4  ;;  %s23_s8 = int_to_ptr.vmem [resolvable:$true] %s22_s8  ;;  %s48_s11 = int_to_ptr.hbm [resolvable:$true] %s47_s11 }
   0x7   :  { %25 = dma.hbm_to_vmem [thread:$0]  %s21_s28, 256, %s23_s8, [#allocation4]  }
   0x8   :  { %s1296_s1 = smov [#allocation8]   ;;  %s1297_s13 = smov 64  }
   0x9   :  { %s49_s12 = sshll.u32 %s1296_s1, 4  ;;  %s1298_s14 = smov 4   ;;  %s50_s12 = int_to_ptr.vmem [resolvable:$true] %s49_s12 }
   0xa   :  { %55 = dma.hbm_to_vmem [thread:$0]  %s48_s11, 2048, %s50_s12, [#allocation7], %s1297_s13, %s1297_s13, %s1298_s14  }
   0xb   :  { %1286 = dma.done.wait [#allocation4], 256  }
   0xc   :  { %1287 = vsyncadd [#allocation4], 4294967040 }
   0xd   :  { %1288 = dma.done.wait [#allocation7], 10240  }
   0xe   :  { %1289 = vsyncadd [#allocation7], 4294957056  ;;  %v835_v0 = vld [vmem:[#allocation6 + $0x70] sm:$0xf]  ;;  %v1112_v1 = vld [vmem:[#allocation6 + $0x74] sm:$0xf0] }
   0xf   :  { %v899_v2 = vld [vmem:[#allocation6 + $0xf0] sm:$0xf]  ;;  %v836_v3 = vor.u32 %v1112_v1, %v835_v0  ;;  %v1128_v4 = vld [vmem:[#allocation6 + $0xf4] sm:$0xf0]  ;;  %v827_v11 = vld [vmem:[#allocation6 + $0x60] sm:$0xf] }
  0x10   :  { %v963_v5 = vld [vmem:[#allocation6 + $0x170] sm:$0xf]  ;;  %v1144_v6 = vld [vmem:[#allocation6 + $0x174] sm:$0xf0]  ;;  %v900_v7 = vor.u32 %v1128_v4, %v899_v2  ;;  %v1110_v13 = vld [vmem:[#allocation6 + $0x64] sm:$0xf0] }
  0x11   :  { %v964_v8 = vor.u32 %v1144_v6, %v963_v5  ;;  %v1027_v9 = vld [vmem:[#allocation6 + $0x1f0] sm:$0xf]  ;;  %v1160_v10 = vld [vmem:[#allocation6 + $0x1f4] sm:$0xf0]  ;;  %476 = vmatpush.bf16.msra.mxu0 %v836_v3  ;;  %v891_v14 = vld [vmem:[#allocation6 + $0xe0] sm:$0xf]  ;;  %v828_v16 = vor.u32 %v1110_v13, %v827_v11 }
  0x12   :  { %v1028_v12 = vor.u32 %v1160_v10, %v1027_v9  ;;  %v1126_v15 = vld [vmem:[#allocation6 + $0xe4] sm:$0xf0]  ;;  %489 = vmatpush.bf16.msra.mxu1 %v900_v7  ;;  %v955_v18 = vld [vmem:[#allocation6 + $0x160] sm:$0xf]  ;;  %v819_v23 = vld [vmem:[#allocation6 + $0x50] sm:$0xf] }
  0x13   :  { %502 = vmatpush.bf16.msra.mxu2 %v964_v8  ;;  %v892_v17 = vor.u32 %v1126_v15, %v891_v14  ;;  %v1142_v19 = vld [vmem:[#allocation6 + $0x164] sm:$0xf0]  ;;  %v1019_v20 = vld [vmem:[#allocation6 + $0x1e0] sm:$0xf]  ;;  %v1108_v24 = vld [vmem:[#allocation6 + $0x54] sm:$0xf0] }
  0x14   :  { %515 = vmatpush.bf16.msra.mxu3 %v1028_v12  ;;  %v956_v21 = vor.u32 %v1142_v19, %v955_v18  ;;  %v1158_v22 = vld [vmem:[#allocation6 + $0x1e4] sm:$0xf0]  ;;  %v883_v26 = vld [vmem:[#allocation6 + $0xd0] sm:$0xf]  ;;  %v1124_v27 = vld [vmem:[#allocation6 + $0xd4] sm:$0xf0]  ;;  %v820_v29 = vor.u32 %v1108_v24, %v819_v23 }
  0x15   :  { %v1020_v25 = vor.u32 %v1158_v22, %v1019_v20  ;;  %v947_v28 = vld [vmem:[#allocation6 + $0x150] sm:$0xf]  ;;  %477 = vmatpush.bf16.msra.mxu0 %v828_v16  ;;  %v1140_v30 = vld [vmem:[#allocation6 + $0x154] sm:$0xf0]  ;;  %v884_v33 = vor.u32 %v1124_v27, %v883_v26  ;;  %v811_v35 = vld [vmem:[#allocation6 + $0x40] sm:$0xf] }
  0x16   :  { %v1011_v31 = vld [vmem:[#allocation6 + $0x1d0] sm:$0xf]  ;;  %v1156_v32 = vld [vmem:[#allocation6 + $0x1d4] sm:$0xf0]  ;;  %490 = vmatpush.bf16.msra.mxu1 %v892_v17  ;;  %v948_v34 = vor.u32 %v1140_v30, %v947_v28  ;;  %v1106_v36 = vld [vmem:[#allocation6 + $0x44] sm:$0xf0] }
  0x17   :  { %503 = vmatpush.bf16.msra.mxu2 %v956_v21  ;;  %v875_v37 = vld [vmem:[#allocation6 + $0xc0] sm:$0xf]  ;;  %v1012_v38 = vor.u32 %v1156_v32, %v1011_v31  ;;  %v1122_v39 = vld [vmem:[#allocation6 + $0xc4] sm:$0xf0]  ;;  %v812_v44 = vor.u32 %v1106_v36, %v811_v35  ;;  %v803_v47 = vld [vmem:[#allocation6 + $0x30] sm:$0xf] }
  0x18   :  { %516 = vmatpush.bf16.msra.mxu3 %v1020_v25  ;;  %v939_v40 = vld [vmem:[#allocation6 + $0x140] sm:$0xf]  ;;  %v1138_v41 = vld [vmem:[#allocation6 + $0x144] sm:$0xf0]  ;;  %v876_v45 = vor.u32 %v1122_v39, %v875_v37  ;;  %v1104_v48 = vld [vmem:[#allocation6 + $0x34] sm:$0xf0] }
  0x19   :  { %v1003_v42 = vld [vmem:[#allocation6 + $0x1c0] sm:$0xf]  ;;  %v1154_v43 = vld [vmem:[#allocation6 + $0x1c4] sm:$0xf0]  ;;  %478 = vmatpush.bf16.msra.mxu0 %v820_v29  ;;  %v940_v46 = vor.u32 %v1138_v41, %v939_v40  ;;  %v867_v49 = vld [vmem:[#allocation6 + $0xb0] sm:$0xf]  ;;  %v804_v56 = vor.u32 %v1104_v48, %v803_v47 }
  0x1a   :  { %491 = vmatpush.bf16.msra.mxu1 %v884_v33  ;;  %v1004_v50 = vor.u32 %v1154_v43, %v1003_v42  ;;  %v1120_v51 = vld [vmem:[#allocation6 + $0xb4] sm:$0xf0]  ;;  %v931_v52 = vld [vmem:[#allocation6 + $0x130] sm:$0xf]  ;;  %v795_v59 = vld [vmem:[#allocation6 + $0x20] sm:$0xf] }
  0x1b   :  { %504 = vmatpush.bf16.msra.mxu2 %v948_v34  ;;  %v1136_v53 = vld [vmem:[#allocation6 + $0x134] sm:$0xf0]  ;;  %v995_v54 = vld [vmem:[#allocation6 + $0x1b0] sm:$0xf]  ;;  %v868_v57 = vor.u32 %v1120_v51, %v867_v49  ;;  %v1102_v60 = vld [vmem:[#allocation6 + $0x24] sm:$0xf0] }
  0x1c   :  { %517 = vmatpush.bf16.msra.mxu3 %v1012_v38  ;;  %v1152_v55 = vld [vmem:[#allocation6 + $0x1b4] sm:$0xf0]  ;;  %v932_v58 = vor.u32 %v1136_v53, %v931_v52  ;;  %v859_v61 = vld [vmem:[#allocation6 + $0xa0] sm:$0xf]  ;;  %v1118_v63 = vld [vmem:[#allocation6 + $0xa4] sm:$0xf0]  ;;  %v796_v4 = vor.u32 %v1102_v60, %v795_v59 }
  0x1d   :  { %479 = vmatpush.bf16.msra.mxu0 %v812_v44  ;;  %v996_v62 = vor.u32 %v1152_v55, %v995_v54  ;;  %v923_v0 = vld [vmem:[#allocation6 + $0x120] sm:$0xf]  ;;  %v1134_v1 = vld [vmem:[#allocation6 + $0x124] sm:$0xf0]  ;;  %v860_v5 = vor.u32 %v1118_v63, %v859_v61  ;;  %v787_v7 = vld [vmem:[#allocation6 + $0x10] sm:$0xf] }
  0x1e   :  { %492 = vmatpush.bf16.msra.mxu1 %v876_v45  ;;  %v987_v2 = vld [vmem:[#allocation6 + $0x1a0] sm:$0xf]  ;;  %v1150_v3 = vld [vmem:[#allocation6 + $0x1a4] sm:$0xf0]  ;;  %v924_v6 = vor.u32 %v1134_v1, %v923_v0  ;;  %v1100_v8 = vld [vmem:[#allocation6 + $0x14] sm:$0xf0] }
  0x1f   :  { %505 = vmatpush.bf16.msra.mxu2 %v940_v46  ;;  %v851_v9 = vld [vmem:[#allocation6 + $0x90] sm:$0xf]  ;;  %v988_v10 = vor.u32 %v1150_v3, %v987_v2  ;;  %v1116_v11 = vld [vmem:[#allocation6 + $0x94] sm:$0xf0]  ;;  %v779_v16 = vld [vmem:[#allocation6] sm:$0xf]  ;;  %v788_v17 = vor.u32 %v1100_v8, %v787_v7 }
  0x20   :  { %518 = vmatpush.bf16.msra.mxu3 %v1004_v50  ;;  %v915_v12 = vld [vmem:[#allocation6 + $0x110] sm:$0xf]  ;;  %v1132_v13 = vld [vmem:[#allocation6 + $0x114] sm:$0xf0]  ;;  %v1098_v18 = vld [vmem:[#allocation6 + $0x4] sm:$0xf0]  ;;  %v852_v21 = vor.u32 %v1116_v11, %v851_v9 }
  0x21   :  { %480 = vmatpush.bf16.msra.mxu0 %v804_v56  ;;  %v979_v14 = vld [vmem:[#allocation6 + $0x190] sm:$0xf]  ;;  %v1148_v15 = vld [vmem:[#allocation6 + $0x194] sm:$0xf0]  ;;  %v843_v19 = vld [vmem:[#allocation6 + $0x80] sm:$0xf]  ;;  %v916_v22 = vor.u32 %v1132_v13, %v915_v12  ;;  %v780_v33 = vor.u32 %v1098_v18, %v779_v16 }
  0x22   :  { %493 = vmatpush.bf16.msra.mxu1 %v868_v57  ;;  %v1114_v20 = vld [vmem:[#allocation6 + $0x84] sm:$0xf0]  ;;  %v907_v23 = vld [vmem:[#allocation6 + $0x100] sm:$0xf]  ;;  %v980_v26 = vor.u32 %v1148_v15, %v979_v14  ;;  %v1111_v28 = vld [vmem:[#allocation6 + $0x74] sm:$0xf] }
  0x23   :  { %506 = vmatpush.bf16.msra.mxu2 %v932_v58  ;;  %v1130_v24 = vld [vmem:[#allocation6 + $0x104] sm:$0xf0]  ;;  %v971_v25 = vld [vmem:[#allocation6 + $0x180] sm:$0xf]  ;;  %v837_v29 = vld [vmem:[#allocation6 + $0x78] sm:$0xf0]  ;;  %v844_v38 = vor.u32 %v1114_v20, %v843_v19 }
  0x24   :  { %519 = vmatpush.bf16.msra.mxu3 %v996_v62  ;;  %v1146_v27 = vld [vmem:[#allocation6 + $0x184] sm:$0xf0]  ;;  %v1127_v30 = vld [vmem:[#allocation6 + $0xf4] sm:$0xf]  ;;  %v901_v31 = vld [vmem:[#allocation6 + $0xf8] sm:$0xf0]  ;;  %v908_v39 = vor.u32 %v1130_v24, %v907_v23  ;;  %v840_v45 = vor.u32 %v1111_v28, %v837_v29 }
  0x25   :  { %481 = vmatpush.bf16.msra.mxu0 %v796_v4  ;;  %v71_v32 = vld [vmem:[#allocation3 + $0x8] sm:$0xff]  ;;  %v1143_v34 = vld [vmem:[#allocation6 + $0x174] sm:$0xf]  ;;  %v972_v44 = vor.u32 %v1146_v27, %v971_v25  ;;  %v904_v47 = vor.u32 %v1127_v30, %v901_v31  ;;  %v1109_v49 = vld [vmem:[#allocation6 + $0x64] sm:$0xf]  ;;  %s1299_s17 = smov [#allocation9]  }
  0x26   :  { %494 = vmatpush.bf16.msra.mxu1 %v860_v5  ;;  %v965_v35 = vld [vmem:[#allocation6 + $0x178] sm:$0xf0]  ;;  %v146_v36 = vunpack.c.l.b16 %v71_v32  ;;  %v70_v37 = vld [vmem:[#allocation3] sm:$0xff]  ;;  %v147_v43 = vunpack.c.h.b16 %v71_v32  ;;  %v829_v50 = vld [vmem:[#allocation6 + $0x68] sm:$0xf0]  ;;  %s764_s18 = sshll.u32 %s1299_s17, 4  ;;  %s765_s18 = int_to_ptr.vmem [resolvable:$true] %s764_s18 }
  0x27   :  { %507 = vmatpush.bf16.msra.mxu2 %v924_v6  ;;  %v1159_v40 = vld [vmem:[#allocation6 + $0x1f4] sm:$0xf]  ;;  %v1029_v41 = vld [vmem:[#allocation6 + $0x1f8] sm:$0xf0]  ;;  %v144_v42 = vunpack.c.l.b16 %v70_v37  ;;  %v145_v46 = vunpack.c.h.b16 %v70_v37  ;;  %v968_v48 = vor.u32 %v1143_v34, %v965_v35  ;;  %v1125_v51 = vld [vmem:[#allocation6 + $0xe4] sm:$0xf]  ;;  %v832_v61 = vor.u32 %v1109_v49, %v829_v50 }
  0x28   :  { %520 = vmatpush.bf16.msra.mxu3 %v988_v10  ;;  %v1032_v52 = vor.u32 %v1159_v40, %v1029_v41  ;;  %v893_v53 = vld [vmem:[#allocation6 + $0xe8] sm:$0xf0]  ;;  %v1141_v54 = vld [vmem:[#allocation6 + $0x164] sm:$0xf]  ;;  %v1344_v56 = vpack.c.b16 %v146_v36, %v146_v36  ;;  %v1348_v60 = vpack.c.b16 %v147_v43, %v147_v43  ;;  %v1107_v1 = vld [vmem:[#allocation6 + $0x54] sm:$0xf] }
  0x29   :  { %482 = vmatpush.bf16.msra.mxu0 %v788_v17  ;;  %v957_v55 = vld [vmem:[#allocation6 + $0x168] sm:$0xf0]  ;;  %v1157_v57 = vld [vmem:[#allocation6 + $0x1e4] sm:$0xf]  ;;  %v1346_v59 = vpack.c.b16 %v144_v42, %v144_v42  ;;  %v1350_v62 = vpack.c.b16 %v145_v46, %v145_v46  ;;  %v896_v63 = vor.u32 %v1125_v51, %v893_v53  ;;  %v821_v2 = vld [vmem:[#allocation6 + $0x58] sm:$0xf0] }
  0x2a   :  { %495 = vmatpush.bf16.msra.mxu1 %v852_v21  ;;  %v1021_v58 = vld [vmem:[#allocation6 + $0x1e8] sm:$0xf0]  ;;  %v960_v0 = vor.u32 %v1141_v54, %v957_v55  ;;  %v1123_v3 = vld [vmem:[#allocation6 + $0xd4] sm:$0xf]  ;;  %v885_v5 = vld [vmem:[#allocation6 + $0xd8] sm:$0xf0]  ;;  %v824_v10 = vor.u32 %v1107_v1, %v821_v2 }
  0x2b   :  { %508 = vmatpush.bf16.msra.mxu2 %v916_v22  ;;  %v1024_v4 = vor.u32 %v1157_v57, %v1021_v58  ;;  %v1139_v6 = vld [vmem:[#allocation6 + $0x154] sm:$0xf]  ;;  %v949_v7 = vld [vmem:[#allocation6 + $0x158] sm:$0xf0]  ;;  %v888_v11 = vor.u32 %v1123_v3, %v885_v5  ;;  %v1105_v13 = vld [vmem:[#allocation6 + $0x44] sm:$0xf] }
  0x2c   :  { %521 = vmatpush.bf16.msra.mxu3 %v980_v26  ;;  %v1155_v8 = vld [vmem:[#allocation6 + $0x1d4] sm:$0xf]  ;;  %v1013_v9 = vld [vmem:[#allocation6 + $0x1d8] sm:$0xf0]  ;;  %v952_v12 = vor.u32 %v1139_v6, %v949_v7  ;;  %v813_v14 = vld [vmem:[#allocation6 + $0x48] sm:$0xf0] }
  0x2d   :  { %483 = vmatpush.bf16.msra.mxu0 %v780_v33  ;;  %v1121_v15 = vld [vmem:[#allocation6 + $0xc4] sm:$0xf]  ;;  %v1016_v16 = vor.u32 %v1155_v8, %v1013_v9  ;;  %v877_v17 = vld [vmem:[#allocation6 + $0xc8] sm:$0xf0]  ;;  %v816_v22 = vor.u32 %v1105_v13, %v813_v14  ;;  %v1103_v25 = vld [vmem:[#allocation6 + $0x34] sm:$0xf] }
  0x2e   :  { %496 = vmatpush.bf16.msra.mxu1 %v844_v38  ;;  %v1137_v18 = vld [vmem:[#allocation6 + $0x144] sm:$0xf]  ;;  %v941_v19 = vld [vmem:[#allocation6 + $0x148] sm:$0xf0]  ;;  %v880_v23 = vor.u32 %v1121_v15, %v877_v17  ;;  %v805_v26 = vld [vmem:[#allocation6 + $0x38] sm:$0xf0] }
  0x2f   :  { %509 = vmatpush.bf16.msra.mxu2 %v908_v39  ;;  %v1153_v20 = vld [vmem:[#allocation6 + $0x1c4] sm:$0xf]  ;;  %v1005_v21 = vld [vmem:[#allocation6 + $0x1c8] sm:$0xf0]  ;;  %v944_v24 = vor.u32 %v1137_v18, %v941_v19  ;;  %v1119_v27 = vld [vmem:[#allocation6 + $0xb4] sm:$0xf]  ;;  %v808_v34 = vor.u32 %v1103_v25, %v805_v26 }
  0x30   :  { %522 = vmatpush.bf16.msra.mxu3 %v972_v44  ;;  %484 = vmatmul.bf16.vlgmr.msra.gmra.mxu0 %v1346_v59  ;;  %v1008_v28 = vor.u32 %v1153_v20, %v1005_v21  ;;  %v869_v29 = vld [vmem:[#allocation6 + $0xb8] sm:$0xf0]  ;;  %v1135_v30 = vld [vmem:[#allocation6 + $0x134] sm:$0xf]  ;;  %v1101_v37 = vld [vmem:[#allocation6 + $0x24] sm:$0xf] }
  0x31   :  { %528 = vmatpush.bf16.msrb.mxu0 %v840_v45  ;;  %497 = vmatmul.bf16.vlgmr.msra.gmra.mxu1 %v1350_v62  ;;  %v933_v31 = vld [vmem:[#allocation6 + $0x138] sm:$0xf0]  ;;  %v1151_v32 = vld [vmem:[#allocation6 + $0x1b4] sm:$0xf]  ;;  %v872_v35 = vor.u32 %v1119_v27, %v869_v29  ;;  %v797_v38 = vld [vmem:[#allocation6 + $0x28] sm:$0xf0] }
  0x32   :  { %541 = vmatpush.bf16.msrb.mxu1 %v904_v47  ;;  %510 = vmatmul.bf16.vlgmr.msra.gmra.mxu2 %v1344_v56  ;;  %v997_v33 = vld [vmem:[#allocation6 + $0x1b8] sm:$0xf0]  ;;  %v936_v36 = vor.u32 %v1135_v30, %v933_v31  ;;  %v1117_v39 = vld [vmem:[#allocation6 + $0xa4] sm:$0xf]  ;;  %v861_v41 = vld [vmem:[#allocation6 + $0xa8] sm:$0xf0]  ;;  %v800_v46 = vor.u32 %v1101_v37, %v797_v38 }
  0x33   :  { %554 = vmatpush.bf16.msrb.mxu2 %v968_v48  ;;  %523 = vmatmul.bf16.vlgmr.msra.gmra.mxu3 %v1348_v60  ;;  %v1000_v40 = vor.u32 %v1151_v32, %v997_v33  ;;  %v1133_v42 = vld [vmem:[#allocation6 + $0x124] sm:$0xf]  ;;  %v925_v43 = vld [vmem:[#allocation6 + $0x128] sm:$0xf0]  ;;  %v864_v47 = vor.u32 %v1117_v39, %v861_v41  ;;  %v1099_v49 = vld [vmem:[#allocation6 + $0x14] sm:$0xf] }
  0x34   :  { %567 = vmatpush.bf16.msrb.mxu3 %v1032_v52  ;;  %v1149_v44 = vld [vmem:[#allocation6 + $0x1a4] sm:$0xf]  ;;  %v989_v45 = vld [vmem:[#allocation6 + $0x1a8] sm:$0xf0]  ;;  %v928_v48 = vor.u32 %v1133_v42, %v925_v43  ;;  %v789_v50 = vld [vmem:[#allocation6 + $0x18] sm:$0xf0] }
  0x35   :  { %529 = vmatpush.bf16.msrb.mxu0 %v832_v61  ;;  %v1115_v51 = vld [vmem:[#allocation6 + $0x94] sm:$0xf]  ;;  %v992_v52 = vor.u32 %v1149_v44, %v989_v45  ;;  %v853_v53 = vld [vmem:[#allocation6 + $0x98] sm:$0xf0]  ;;  %v792_v61 = vor.u32 %v1099_v49, %v789_v50  ;;  %v1097_v1 = vld [vmem:[#allocation6 + $0x4] sm:$0xf] }
  0x36   :  { %542 = vmatpush.bf16.msrb.mxu1 %v896_v63  ;;  %v1131_v54 = vld [vmem:[#allocation6 + $0x114] sm:$0xf]  ;;  %v917_v55 = vld [vmem:[#allocation6 + $0x118] sm:$0xf0]  ;;  %v856_v63 = vor.u32 %v1115_v51, %v853_v53  ;;  %v781_v2 = vld [vmem:[#allocation6 + $0x8] sm:$0xf0] }
  0x37   :  { %555 = vmatpush.bf16.msrb.mxu2 %v960_v0  ;;  %v1147_v57 = vld [vmem:[#allocation6 + $0x194] sm:$0xf]  ;;  %v981_v58 = vld [vmem:[#allocation6 + $0x198] sm:$0xf0]  ;;  %v920_v0 = vor.u32 %v1131_v54, %v917_v55  ;;  %v1113_v3 = vld [vmem:[#allocation6 + $0x84] sm:$0xf] }
  0x38   :  { %568 = vmatpush.bf16.msrb.mxu3 %v1024_v4  ;;  %v984_v4 = vor.u32 %v1147_v57, %v981_v58  ;;  %v845_v5 = vld [vmem:[#allocation6 + $0x88] sm:$0xf0]  ;;  %v1129_v6 = vld [vmem:[#allocation6 + $0x104] sm:$0xf]  ;;  %v1168_v14 = vld [vmem:[#allocation8 + $0x38] sm:$0xff] }
  0x39   :  { %530 = vmatpush.bf16.msrb.mxu0 %v824_v10  ;;  %v909_v7 = vld [vmem:[#allocation6 + $0x108] sm:$0xf0]  ;;  %v1145_v8 = vld [vmem:[#allocation6 + $0x184] sm:$0xf]  ;;  %v784_v10 = vor.u32 %v1097_v1, %v781_v2  ;;  %v1167_v15 = vld [vmem:[#allocation8 + $0x30] sm:$0xff] }
  0x3a   :  { %543 = vmatpush.bf16.msrb.mxu1 %v888_v11  ;;  %v973_v9 = vld [vmem:[#allocation6 + $0x188] sm:$0xf0]  ;;  %v848_v11 = vor.u32 %v1113_v3, %v845_v5  ;;  %v1165_v17 = vld [vmem:[#allocation8 + $0x20] sm:$0xff]  ;;  %v1164_v18 = vld [vmem:[#allocation8 + $0x18] sm:$0xff] }
  0x3b   :  { %556 = vmatpush.bf16.msrb.mxu2 %v952_v12  ;;  %v912_v12 = vor.u32 %v1129_v6, %v909_v7  ;;  %v976_v13 = vor.u32 %v1145_v8, %v973_v9  ;;  %v1163_v19 = vld [vmem:[#allocation8 + $0x10] sm:$0xff]  ;;  %v1162_v20 = vld [vmem:[#allocation8 + $0x8] sm:$0xff]  ;;  %v1176_v21 = vld [vmem:[#allocation8 + $0x78] sm:$0xff] }
  0x3c   :  { %569 = vmatpush.bf16.msrb.mxu3 %v1016_v16  ;;  %v1166_v16 = vld [vmem:[#allocation8 + $0x28] sm:$0xff]  ;;  %v1171_v25 = vld [vmem:[#allocation8 + $0x50] sm:$0xff]  ;;  %v1169_v38 = vld [vmem:[#allocation8 + $0x40] sm:$0xff] }
  0x3d   :  { %531 = vmatpush.bf16.msrb.mxu0 %v816_v22  ;;  %v1161_v22 = vld [vmem:[#allocation8] sm:$0xff]  ;;  %v1170_v31 = vld [vmem:[#allocation8 + $0x48] sm:$0xff]  ;;  %v1185_v2 = vld [vmem:[%s1377_s5] ss:$0 sm:$0xff]  ;;  %s766_s5 = sshll.u32 %s1378_s6, 4  ;;  %s767_s5 = int_to_ptr.hbm [resolvable:$true] %s766_s5 }
  0x3e   :  { %544 = vmatpush.bf16.msrb.mxu1 %v880_v23 }
  0x3f   :  { %557 = vmatpush.bf16.msrb.mxu2 %v944_v24  ;;  %v1172_v24 = vld [vmem:[#allocation8 + $0x58] sm:$0xff] }
  0x40   :  { %570 = vmatpush.bf16.msrb.mxu3 %v1008_v28 }
  0x41   :  { %532 = vmatpush.bf16.msrb.mxu0 %v808_v34  ;;  %v583_v34 = vstv %s1375_s3 }
  0x42   :  { %545 = vmatpush.bf16.msrb.mxu1 %v872_v35 }
  0x43   :  { %558 = vmatpush.bf16.msrb.mxu2 %v936_v36 }
  0x44   :  { %571 = vmatpush.bf16.msrb.mxu3 %v1000_v40 }
  0x45   :  { %533 = vmatpush.bf16.msrb.mxu0 %v800_v46 }
  0x46   :  { %546 = vmatpush.bf16.msrb.mxu1 %v864_v47 }
  0x47   :  { %559 = vmatpush.bf16.msrb.mxu2 %v928_v48 }
  0x48   :  { %572 = vmatpush.bf16.msrb.mxu3 %v992_v52 }
  0x49   :  { %534 = vmatpush.bf16.msrb.mxu0 %v792_v61 }
  0x4a   :  { %547 = vmatpush.bf16.msrb.mxu1 %v856_v63 }
  0x4b   :  { %560 = vmatpush.bf16.msrb.mxu2 %v920_v0 }
  0x4c   :  { %573 = vmatpush.bf16.msrb.mxu3 %v984_v4 }
  0x4d   :  { %535 = vmatpush.bf16.msrb.mxu0 %v784_v10 }
  0x4e   :  { %548 = vmatpush.bf16.msrb.mxu1 %v848_v11 }
  0x4f   :  { %561 = vmatpush.bf16.msrb.mxu2 %v912_v12 }
  0x50   :  { %574 = vmatpush.bf16.msrb.mxu3 %v976_v13  ;;  %536 = vmatmul.bf16.vlgmr.msrb.gmra.mxu0 %v1346_v59  ;;  %v1175_v59 = vld [vmem:[#allocation8 + $0x70] sm:$0xff] }
  0x51   :  { %722 = vmatpush.bf16.msra.mxu0 %v1168_v14  ;;  %549 = vmatmul.bf16.vlgmr.msrb.gmra.mxu1 %v1350_v62  ;;  %v136_v62 = vld [vmem:[%s1374_s2] sm:$0x3] }
  0x52   :  { %562 = vmatmul.bf16.vlgmr.msrb.gmra.mxu2 %v1344_v56  ;;  %735 = vmatpush.bf16.msra.mxu1 %v1176_v21  ;;  %v1174_v56 = vld [vmem:[#allocation8 + $0x68] sm:$0xff]  ;;  %v138_v23 = vperm.slane %v136_v62, 0  ;;  %v139_v44 = vperm.slane %v136_v62, 1 }
  0x53   :  { %575 = vmatmul.bf16.vlgmr.msrb.gmra.mxu3 %v1348_v60  ;;  %v1173_v60 = vld [vmem:[#allocation8 + $0x60] sm:$0xff] }
  0x55   :  { %723 = vmatpush.bf16.msra.mxu0 %v1167_v15 }
  0x56   :  { %736 = vmatpush.bf16.msra.mxu1 %v1175_v59 }
  0x59   :  { %724 = vmatpush.bf16.msra.mxu0 %v1166_v16 }
  0x5a   :  { %737 = vmatpush.bf16.msra.mxu1 %v1174_v56 }
  0x5d   :  { %725 = vmatpush.bf16.msra.mxu0 %v1165_v17 }
  0x5e   :  { %738 = vmatpush.bf16.msra.mxu1 %v1173_v60 }
  0x61   :  { %726 = vmatpush.bf16.msra.mxu0 %v1164_v18 }
  0x62   :  { %739 = vmatpush.bf16.msra.mxu1 %v1172_v24 }
  0x65   :  { %727 = vmatpush.bf16.msra.mxu0 %v1163_v19 }
  0x66   :  { %740 = vmatpush.bf16.msra.mxu1 %v1171_v25 }
  0x69   :  { %728 = vmatpush.bf16.msra.mxu0 %v1162_v20 }
  0x6a   :  { %741 = vmatpush.bf16.msra.mxu1 %v1170_v31 }
  0x6d   :  { %729 = vmatpush.bf16.msra.mxu0 %v1161_v22 }
  0x6e   :  { %742 = vmatpush.bf16.msra.mxu1 %v1169_v38 }
  0xad   :  { %v485_v26 = vpop.f32.mrf.mxu0 }
  0xae   :  { %v486_v27 = vadd.f32 %v485_v26, %v138_v23  ;;  %v498_v28 = vpop.f32.mrf.mxu1 }
  0xb0   :  { %v499_v29 = vadd.f32 %v498_v28, %v486_v27 }
  0xb5   :  { %v511_v30 = vpop.f32.mrf.mxu2  ;;  %v487_v36 = vpop.f32.mrf.mxu0 }
  0xb6   :  { %v512_v32 = vadd.f32 %v511_v30, %v499_v29  ;;  %v524_v33 = vpop.f32.mrf.mxu3  ;;  %v500_v37 = vpop.f32.mrf.mxu1 }
  0xb8   :  { %v525_v35 = vadd.f32 %v524_v33, %v512_v32 }
  0xba   :  { %vm581_vm0 = vcmp.ge.f32.partialorder %v525_v35, 0.0  ;;  %v584_v39 = vmul.f32 %v583_v34, %v525_v35 }
  0xbc   :  { %v586_v40 = vsel %vm581_vm0, %v525_v35, %v584_v39 }
  0xbd   :  { %v588_v41 = vpack.c.bf16 %v586_v40, %v586_v40  ;;  %v513_v42 = vpop.f32.mrf.mxu2 }
  0xbe   :  { %v526_v43 = vpop.f32.mrf.mxu3 }
  0xbf   :  { %730 = vmatmul.bf16.vlgmr.msra.gmra.mxu0 %v588_v41 }
  0xcd   :  { %v537_v45 = vpop.f32.mrf.mxu0 }
  0xce   :  { %v538_v46 = vadd.f32 %v537_v45, %v139_v44  ;;  %v550_v47 = vpop.f32.mrf.mxu1 }
  0xd0   :  { %v551_v48 = vadd.f32 %v550_v47, %v538_v46 }
  0xd5   :  { %v563_v49 = vpop.f32.mrf.mxu2  ;;  %v539_v52 = vpop.f32.mrf.mxu0 }
  0xd6   :  { %v564_v50 = vadd.f32 %v563_v49, %v551_v48  ;;  %v576_v51 = vpop.f32.mrf.mxu3  ;;  %v552_v53 = vpop.f32.mrf.mxu1 }
  0xd8   :  { %v577_v54 = vadd.f32 %v576_v51, %v564_v50 }
  0xda   :  { %vm582_vm1 = vcmp.ge.f32.partialorder %v577_v54, 0.0  ;;  %v585_v55 = vmul.f32 %v583_v34, %v577_v54 }
  0xdc   :  { %v587_v57 = vsel %vm582_vm1, %v577_v54, %v585_v55 }
  0xdd   :  { %v589_v58 = vpack.c.bf16 %v587_v57, %v587_v57  ;;  %v565_v61 = vpop.f32.mrf.mxu2 }
  0xde   :  { %v578_v63 = vpop.f32.mrf.mxu3 }
  0xdf   :  { %743 = vmatmul.bf16.vlgmr.msra.gmra.mxu1 %v589_v58 }
 0x13c   :  { %v731_v0 = vpop.f32.mrf.mxu0 }
 0x13d   :  { %v732_v3 = vadd.f32 %v1185_v2, %v731_v0 }
 0x144   :  { %v733_v1 = vpop.f32.mrf.mxu0 }
 0x15c   :  { %v744_v4 = vpop.f32.mrf.mxu1 }
 0x15d   :  { %v745_v5 = vadd.f32 %v744_v4, %v732_v3 }
 0x15f   :  { %748 = vmax.xlane.f32.xlu0 %v745_v5 }
 0x164   :  { %v746_v6 = vpop.f32.mrf.mxu1 }
 0x1d2   :  { %v749_v7 = vpop.xlane.xlu0 %748 }
 0x1d3   :  { %v750_v8 = vsub.f32 %v745_v5, %v749_v7 }
 0x1d5   :  { %v751_v9 = vmul.f32 1.442695, %v750_v8 }
 0x1d7   :  { %1186 = vpow2.f32 %v751_v9 }
 0x1dd   :  { %v1187_v10 = vpop.eup %1186 }
 0x1de   :  { %753 = vadd.xlane.f32.xlu0 %v1187_v10 }
 0x251   :  { %v754_v11 = vpop.xlane.xlu0 %753 }
 0x252   :  { %1188 = vlog2.f32 %v754_v11 }
 0x258   :  { %v1189_v12 = vpop.eup %1188 }
 0x259   :  { %v756_v13 = vmul.f32 0.6931472, %v1189_v12 }
 0x25b   :  { %v757_v14 = vsub.f32 %v750_v8, %v756_v13 }
 0x25d   :  { %758 = vst [vmem:[#allocation9] sm:$0xff] %v757_v14 }
 0x25e   :  { %769 = dma.vmem_to_hbm [thread:$0]  %s765_s18, 128, %s767_s5, [#allocation5]  }
 0x25f   :  { %1290 = dma.done.wait [#allocation5], 128  }
 0x260   :  { %1291 = vsyncadd [#allocation5], 4294967168 }
 0x261   :  { %774 = vsyncpa [#allocation4], 1 }
 0x262   :  { %775 = vsyncpa [#allocation7], 1 }
 0x263   :  { %776 = vsyncpa [#allocation5], 1 }

</bundles_post_ra>
